<compile_context>
chip_gen: v7x
topology: tpu7x:2x2x1
jax: 0.10.0
libtpu: 0.0.40
codegen_flags: <defaults>
</compile_context>

<pallas_src>
import functools
import math

import jax
import jax.numpy as jnp
from jax.experimental import pallas as pl
from jax.experimental.pallas import tpu as pltpu


# ---------------------------------------------------------------------------
# Parameter setup (mirrors BROLinear.__init__ with id_init=True)
# ---------------------------------------------------------------------------
def mask_mapping(in_channels: int, mask_level: float) -> int:
    assert 0.0 <= mask_level <= 1.0
    if mask_level == 0:
        return 1
    elif mask_level == 0.25:
        return in_channels // 4
    elif mask_level == 0.5:
        return in_channels // 2
    elif mask_level == 0.75:
        return in_channels // 4 * 3
    elif mask_level == 1:
        return in_channels - 1
    return int(in_channels * mask_level)


def init_bro_params(in_features: int, out_features: int, mask_level: float = 0.5):
    """Deterministic id_init of BROLinear parameters (no checkpoint load)."""
    max_features = max(in_features, out_features)
    half = mask_mapping(max_features, mask_level)
    V = jnp.zeros((max_features, half), dtype=jnp.float32)
    V = V.at[:half, :].set(jnp.eye(half, dtype=jnp.float32))
    bias = jnp.zeros((max_features,), dtype=jnp.float32)
    return V, bias, max_features, half


def get_weights(V: jnp.ndarray, max_features: int, half: int) -> jnp.ndarray:
    """W = I - 2 V (V^T V + eps I_half)^-1 V^T  (training-mode weights)."""
    identity = jnp.eye(max_features, dtype=jnp.float32)
    identity_half = jnp.eye(half, dtype=jnp.float32)
    Sigma = V.T @ V                                   # (half, half)
    eps = jnp.mean(jnp.diagonal(Sigma)) * 1e-5
    Sigma = Sigma + eps * identity_half
    # TODO(synk): torch.linalg.solve has no Pallas equivalent; solved in plain JAX.
    W = identity - 2.0 * (V @ jnp.linalg.solve(Sigma, V.T))
    return W                                          # (max, max)


# ---------------------------------------------------------------------------
# Helpers
# ---------------------------------------------------------------------------
def _round_up(x: int, m: int) -> int:
    return (x + m - 1) // m * m


def _pick_feature_tile(dim: int, target: int) -> int:
    """Largest multiple-of-128 divisor of `dim` that is <= target.

    If no divisor near the target exists (F_pad = 640, 896, ...), use a single
    full-width tile rather than collapsing to 128-wide DMAs.
    """
    best = 128
    for cand in range(128, min(dim, target) + 1, 128):
        if dim % cand == 0:
            best = cand
    if best * 2 <= target and dim <= 2 * target:
        best = dim
    return best


def prepare_bro_operands(W: jnp.ndarray, bias: jnp.ndarray, *,
                         mm_dtype=jnp.bfloat16):
    """One-time preprocessing (hoisted out of the per-call hot path).

    Transposes W (strict F.linear semantics; BRO's W is symmetric so this is a
    numerical no-op, but costs nothing here), pads to a lane-dense F_pad
    multiple of 128 and casts to the MXU matmul dtype.
    """
    F = W.shape[0]
    assert W.shape == (F, F) and bias.shape == (F,)
    F_pad = _round_up(F, 128)
    wt = W.T
    if F_pad != F:
        wt = jnp.pad(wt, ((0, F_pad - F), (0, F_pad - F)))
        bias = jnp.pad(bias, (0, F_pad - F))
    w_mm = wt.astype(mm_dtype)                        # (F_pad, F_pad), y = x @ w_mm
    b2 = bias.astype(jnp.float32).reshape(1, F_pad)   # f32 bias row
    return w_mm, b2


# ---------------------------------------------------------------------------
# Pallas kernels: fused  y = relu(x @ W^T + b)
# ---------------------------------------------------------------------------
def _bro_kernel_single_k(x_ref, w_ref, b_ref, o_ref):
    # Single K step: no accumulator scratch, no init/finalize round-trip.
    prod = jnp.dot(x_ref[...], w_ref[...], preferred_element_type=jnp.float32)
    o_ref[...] = jnp.maximum(prod + b_ref[...], 0.0).astype(o_ref.dtype)


def _bro_kernel_multi_k(x_ref, w_ref, b_ref, o_ref, acc_ref, *, nk: int):
    # K-streamed: f32 VMEM accumulator, final step fused with bias + ReLU so the
    # last partial product is never stored/reloaded through the scratch.
    k = pl.program_id(2)
    prod = jnp.dot(x_ref[...], w_ref[...], preferred_element_type=jnp.float32)

    @pl.when(k == 0)
    def _():
        acc_ref[...] = prod

    @pl.when(jnp.logical_and(k > 0, k < nk - 1))
    def _():
        acc_ref[...] += prod

    @pl.when(k == nk - 1)
    def _():
        y = acc_ref[...] + prod + b_ref[...]
        o_ref[...] = jnp.maximum(y, 0.0).astype(o_ref.dtype)


# ---------------------------------------------------------------------------
# Wrapper
# ---------------------------------------------------------------------------
def bro_linear_forward(x: jnp.ndarray, w_mm: jnp.ndarray, b2: jnp.ndarray, *,
                       out_dtype=None,
                       tm: int = 512, tn: int = 512, tk: int = 512,
                       resident_vmem_budget: int = 40 * 2**20) -> jnp.ndarray:
    """BROLinear forward: relu(x @ W^T + bias) with preprocessed (w_mm, b2)."""
    B, F = x.shape
    F_pad = w_mm.shape[0]
    assert w_mm.shape == (F_pad, F_pad) and b2.shape == (1, F_pad) and F <= F_pad

    out_dtype = x.dtype if out_dtype is None else out_dtype
    mm_dtype = w_mm.dtype
    mm_bytes = jnp.dtype(mm_dtype).itemsize
    out_bytes = jnp.dtype(out_dtype).itemsize

    # bf16 packs 2 rows per sublane -> 16-row batch quantum (avoids masked
    # packed vregs on v5e); f32 only needs 8.
    batch_quantum = 16 if mm_bytes < 4 else 8
    B_pad = _round_up(B, batch_quantum)
    tm = max(batch_quantum, min(_round_up(tm, batch_quantum), B_pad))

    def vmem_need(tm_, tn_, tk_, nk_):
        need = (2 * tm_ * tk_ * mm_bytes          # x tiles (double-buffered)
                + 2 * tk_ * tn_ * mm_bytes        # W tiles
                + 2 * tm_ * tn_ * out_bytes       # output tiles
                + 2 * 8 * tn_ * 4)                # bias (sublane-padded)
        if nk_ > 1:
            need += tm_ * tn_ * 4                 # f32 accumulator scratch
        return need

    # Resident-W variant: tk = tn = F_pad -> W BlockSpec index is constant, so
    # the runtime fetches W from HBM exactly once for the whole kernel.
    if vmem_need(tm, F_pad, F_pad, 1) <= resident_vmem_budget:
        tn_eff, tk_eff = F_pad, F_pad
    else:
        tn_eff = _pick_feature_tile(F_pad, tn)
        tk_eff = _pick_feature_tile(F_pad, tk)

    grid_m = pl.cdiv(B_pad, tm)                   # ragged last batch tile is OK
    grid_n = F_pad // tn_eff

    # v7x has 2 TensorCores sharded over the "parallel" dims: expose >= 2
    # parallel blocks when the problem allows (harmless on single-TC v5e/v6e).
    if grid_m * grid_n == 1:
        if tm >= 2 * batch_quantum:
            tm = _round_up(tm // 2, batch_quantum)
            grid_m = pl.cdiv(B_pad, tm)
        elif tn_eff % 256 == 0:
            tn_eff //= 2
            grid_n = F_pad // tn_eff

    nk = F_pad // tk_eff
    grid = (grid_m, grid_n, nk)

    # Pad x: feature dim to the lane-dense F_pad, batch only to the sublane quantum.
    if (B_pad, F_pad) != (B, F):
        x = jnp.pad(x, ((0, B_pad - B), (0, F_pad - F)))
    x_mm = x.astype(mm_dtype)

    need = vmem_need(tm, tn_eff, tk_eff, nk)
    vmem_limit = int(min(max(int(1.3 * need) + (2 << 20), 16 << 20), 52 << 20))

    # Bytes include W / x re-reads under the chosen tiling.
    w_reads = 1 if (grid_n == 1 and nk == 1) else grid_m
    cost = pl.CostEstimate(
        flops=2 * grid_m * tm * F_pad * F_pad,
        transcendentals=0,
        bytes_accessed=(grid_n * B_pad * F_pad * mm_bytes      # x (re-read per N tile)
                        + w_reads * F_pad * F_pad * mm_bytes   # W
                        + B_pad * F_pad * out_bytes            # y write
                        + grid_m * grid_n * tn_eff * 4),       # bias
    )

    if nk == 1:
        kernel = _bro_kernel_single_k
        scratch = []
    else:
        kernel = functools.partial(_bro_kernel_multi_k, nk=nk)
        scratch = [pltpu.VMEM((tm, tn_eff), jnp.float32)]

    out = pl.pallas_call(
        kernel,
        out_shape=jax.ShapeDtypeStruct((B_pad, F_pad), out_dtype),
        grid_spec=pltpu.PrefetchScalarGridSpec(
            num_scalar_prefetch=0,
            grid=grid,
            in_specs=[
                pl.BlockSpec((tm, tk_eff), lambda i, j, k: (i, k)),      # x
                pl.BlockSpec((tk_eff, tn_eff), lambda i, j, k: (k, j)),  # W^T
                pl.BlockSpec((1, tn_eff), lambda i, j, k: (0, j)),       # bias
            ],
            out_specs=pl.BlockSpec((tm, tn_eff), lambda i, j, k: (i, j)),
            scratch_shapes=scratch,
        ),
        compiler_params=pltpu.CompilerParams(
            dimension_semantics=("parallel", "parallel", "arbitrary"),
            vmem_limit_bytes=vmem_limit,
        ),
        cost_estimate=cost,
    )(x_mm, w_mm, b2)

    return out[:B, :F]


# ---------------------------------------------------------------------------
# Demo / correctness check
# ---------------------------------------------------------------------------
if __name__ == "__main__":
    def run_case(in_features, out_features, batch, key, **fwd_kwargs):
        V, bias, max_features, half = init_bro_params(in_features, out_features,
                                                      mask_level=0.5)
        W = get_weights(V, max_features, half)
        w_mm, b2 = prepare_bro_operands(W, bias)      # one-time preprocessing
        x = jax.random.normal(key, (batch, max_features), dtype=jnp.float32)

        out = bro_linear_forward(x, w_mm, b2, **fwd_kwargs)
        out = jax.block_until_ready(out)

        # Reference with matching precision (bf16 operands, f32 accumulate).
        xb = x.astype(jnp.bfloat16).astype(jnp.float32)
        Wb = W.astype(jnp.bfloat16).astype(jnp.float32)
        ref = jnp.maximum(xb @ Wb.T + bias[None, :], 0.0)

        assert out.shape == (batch, max_features)
        assert jnp.allclose(out, ref, atol=2e-3, rtol=2e-3), "mismatch vs reference"

    key = jax.random.PRNGKey(0)
    k1, k2, k3 = jax.random.split(key, 3)
    run_case(32, 32, 16, k1)                 # aligned shapes, resident-W single-K path
    run_case(40, 40, 13, k2)                 # odd batch / feature sizes -> padding path
    # Force the K-streamed accumulator path (multi-step K grid) on a small problem.
    run_case(300, 300, 40, k3, tn=128, tk=128, resident_vmem_budget=0)

    print("KERNEL_OK")
</pallas_src>

<mosaic_0001>
module attributes {stable_mosaic.version = 11 : i64} {
  func.func @_bro_kernel_single_k(%arg0: i32, %arg1: i32, %arg2: i32, %arg3: memref<16x128xbf16, #tpu.memory_space<vmem>>, %arg4: memref<128x128xbf16, #tpu.memory_space<vmem>>, %arg5: memref<1x128xf32, #tpu.memory_space<vmem>>, %arg6: memref<16x128xf32, #tpu.memory_space<vmem>>) attributes {dimension_semantics = [#tpu.dimension_semantics<parallel>, #tpu.dimension_semantics<parallel>, #tpu.dimension_semantics<arbitrary>], iteration_bounds = array<i64: 1, 1, 1>, scalar_prefetch = 0 : i64, scratch_operands = 0 : i64, tpu.core_type = #tpu.core_type<tc>, window_params = [{transform_indices = @transform_0, window_bounds = array<i64: 16, 128>}, {transform_indices = @transform_1, window_bounds = array<i64: 128, 128>}, {transform_indices = @transform_2, window_bounds = array<i64: 1, 128>}, {transform_indices = @transform_3, window_bounds = array<i64: 16, 128>}]} {
    %c0 = arith.constant 0 : index
    %c0_0 = arith.constant 0 : index
    %0 = vector.load %arg3[%c0, %c0_0] : memref<16x128xbf16, #tpu.memory_space<vmem>>, vector<16x128xbf16>
    %c0_1 = arith.constant 0 : index
    %c0_2 = arith.constant 0 : index
    %1 = vector.load %arg4[%c0_1, %c0_2] : memref<128x128xbf16, #tpu.memory_space<vmem>>, vector<128x128xbf16>
    %cst = arith.constant dense<0.000000e+00> : vector<16x128xf32>
    %2 = tpu.matmul %0, %1, %cst {dimension_numbers = #tpu.dot_dimension_numbers<[1], [0], [0], [1], [0, 0, 1, 1], [], []>} : vector<16x128xbf16>, vector<128x128xbf16>, vector<16x128xf32> -> vector<16x128xf32>
    %c0_3 = arith.constant 0 : index
    %c0_4 = arith.constant 0 : index
    %3 = vector.load %arg5[%c0_3, %c0_4] : memref<1x128xf32, #tpu.memory_space<vmem>>, vector<1x128xf32>
    %4 = vector.broadcast %3 : vector<1x128xf32> to vector<16x128xf32>
    %5 = arith.addf %2, %4 : vector<16x128xf32>
    %cst_5 = arith.constant 0.000000e+00 : f32
    %6 = vector.broadcast %cst_5 : f32 to vector<16x128xf32>
    %7 = arith.maximumf %5, %6 : vector<16x128xf32>
    %c0_6 = arith.constant 0 : index
    %c0_7 = arith.constant 0 : index
    %8 = vector.load %arg6[%c0_6, %c0_7] : memref<16x128xf32, #tpu.memory_space<vmem>>, vector<16x128xf32>
    tpu.vector_store %arg6[%c0_6, %c0_7], %7 {strides = array<i32>} : memref<16x128xf32, #tpu.memory_space<vmem>>, vector<16x128xf32>,
    return
  }
  func.func @transform_0(%arg0: i32, %arg1: i32, %arg2: i32) -> (i32, i32) {
    %c0_i32 = arith.constant 0 : i32
    return %arg0, %arg2 : i32, i32
  }
  func.func @transform_1(%arg0: i32, %arg1: i32, %arg2: i32) -> (i32, i32) {
    %c0_i32 = arith.constant 0 : i32
    return %arg2, %arg1 : i32, i32
  }
  func.func @transform_2(%arg0: i32, %arg1: i32, %arg2: i32) -> (i32, i32) {
    %c0_i32 = arith.constant 0 : i32
    %c0_i32_0 = arith.constant 0 : i32
    return %c0_i32, %arg1 : i32, i32
  }
  func.func @transform_3(%arg0: i32, %arg1: i32, %arg2: i32) -> (i32, i32) {
    %c0_i32 = arith.constant 0 : i32
    return %arg0, %arg1 : i32, i32
  }
}

</mosaic_0001>

<bundles_post_ra>
// kernel: tpu_custom_call.1
= control target key start
LH: loop header
LB: loop body
LE: loop exit
PB: predicated region body
PF: predicated region fallthrough
CT: control target
= control target key end

     0   :  { %8 = vsyncpa [#allocation3], 0  ;;  %s383_s0 = inlined_call_operand.hbm [shape: bf16[16,128], index: 0, kind: input, shape index: {}]   ;;  %s384_s1 = inlined_call_operand.hbm [shape: bf16[128,128], index: 1, kind: input, shape index: {}]   ;;  %s385_s2 = inlined_call_operand.vmem [shape: f32[1,128], index: 2, kind: input, shape index: {}]   ;;  %s386_s3 = inlined_call_operand.hbm [shape: f32[16,128], index: 3, kind: output, shape index: {}]  }
   0x1   :  { %9 = vsyncpa [#allocation6], 0 }
   0x2   :  { %10 = vsyncpa [#allocation4], 0  ;;  %s315_s12 = smov [#allocation2]   ;;  %s243_s16 = scalar_lea.hbm %s383_s0, 128 }
   0x3   :  { %s16_s13 = sshll.u32 %s315_s12, 4  ;;  %p244_p0 = scmp.ne.s32.totalorder %s383_s0, %s243_s16  ;;  %s17_s13 = int_to_ptr.vmem [resolvable:$true] %s16_s13 }
   0x4   :  { %p247_p1 = scmp.lt.u32.totalorder %s243_s16, %s383_s0 }
   0x6   :  { %p249_p2 = pnand %p247_p1, %p244_p0 }
   0x8   :  { %252 = shalt.err (!%p249_p2)
}
   0x9   :  { %s253_s21 = scalar_lea.vmem %s17_s13, 128  ;;  %p258_p4 = scmp.lt.s32.totalorder %s17_s13, %s17_s13 }
   0xa   :  { %p254_p3 = scmp.ne.s32.totalorder %s17_s13, %s253_s21  ;;  %p259_p5 = scmp.lt.s32.totalorder %s253_s21, %s253_s21 }
   0xc   :  { %p260_p6 = por %p259_p5, %p258_p4 }
   0xe   :  { %p261_p7 = pnand %p260_p6, %p254_p3 }
  0x10   :  { %264 = shalt.err (!%p261_p7)
}
  0x11   :  { %s316_s22 = smov 64   ;;  %s317_s23 = smov 4  }
  0x12   :  { %22 = dma.hbm_to_vmem [thread:$0]  %s383_s0, 128, %s17_s13, [#allocation3], %s316_s22, %s316_s22, %s317_s23  }
  0x13   :  { %s318_s26 = smov [#allocation5]   ;;  %s265_s30 = scalar_lea.hbm %s384_s1, 1024 }
  0x14   :  { %s28_s27 = sshll.u32 %s318_s26, 4  ;;  %p266_p8 = scmp.ne.s32.totalorder %s384_s1, %s265_s30  ;;  %s29_s27 = int_to_ptr.vmem [resolvable:$true] %s28_s27 }
  0x15   :  { %p269_p9 = scmp.lt.u32.totalorder %s265_s30, %s384_s1 }
  0x17   :  { %p271_p10 = pnand %p269_p9, %p266_p8 }
  0x19   :  { %274 = shalt.err (!%p271_p10)
}
  0x1a   :  { %s275_s8 = scalar_lea.vmem %s29_s27, 1024  ;;  %p280_p12 = scmp.lt.s32.totalorder %s29_s27, %s29_s27 }
  0x1b   :  { %p276_p11 = scmp.ne.s32.totalorder %s29_s27, %s275_s8  ;;  %p281_p13 = scmp.lt.s32.totalorder %s275_s8, %s275_s8 }
  0x1d   :  { %p282_p0 = por %p281_p13, %p280_p12 }
  0x1f   :  { %p283_p1 = pnand %p282_p0, %p276_p11 }
  0x21   :  { %286 = shalt.err (!%p283_p1)
}
  0x22   :  { %34 = dma.hbm_to_vmem [thread:$0]  %s384_s1, 1024, %s29_s27, [#allocation6], %s316_s22, %s316_s22, %s317_s23  }
  0x23   :  { %309 = dma.done.wait [#allocation3], 128  }
  0x24   :  { %310 = vsyncadd [#allocation3], 4294967168 }
  0x25   :  { %311 = dma.done.wait [#allocation6], 1024  }
  0x26   :  { %312 = vsyncadd [#allocation6], 4294966272  ;;  %v319_v0 = vmov 0.0   ;;  %vm320_vm0 = vmmov 0   ;;  %v234_v1 = vld [vmem:[#allocation5] sm:$0xff]   ;;  %v235_v2 = vld [vmem:[#allocation5 + $0x8] sm:$0xff]  }
  0x27   :  { %205 = vmatprep.subr.bf16.mxu0 %v319_v0  ;;  %221 = vmatprep.mubr.msk.bf16.mxu0 %vm320_vm0, %v319_v0  ;;  %v236_v3 = vld [vmem:[#allocation5 + $0x10] sm:$0xff]   ;;  %v237_v4 = vld [vmem:[#allocation5 + $0x18] sm:$0xff]   ;;  %v238_v5 = vld [vmem:[#allocation5 + $0x20] sm:$0xff]   ;;  %s321_s11 = smov [#allocation7]  }
  0x28   :  { %206 = vmatpush3.bf16.msra.mxu0 %v234_v1  ;;  %v239_v6 = vld [vmem:[#allocation5 + $0x28] sm:$0xff]   ;;  %v240_v7 = vld [vmem:[#allocation5 + $0x30] sm:$0xff]   ;;  %v241_v8 = vld [vmem:[#allocation5 + $0x38] sm:$0xff]   ;;  %s173_s12 = sshll.u32 %s321_s11, 4  ;;  %s174_s12 = int_to_ptr.vmem [resolvable:$true] %s173_s12 }
  0x29   :  { %207 = vmatprep.subr.bf16.mxu0 %v319_v0  ;;  %v242_v9 = vld [vmem:[#allocation2] sm:$0xff]   ;;  %s287_s13 = scalar_lea.vmem %s174_s12, 256  ;;  %p292_p3 = scmp.lt.s32.totalorder %s174_s12, %s174_s12 }
  0x2a   :  { %v186_v10 = vld [vmem:[%s385_s2] ss:$0 sm:$0xff]  ;;  %p288_p2 = scmp.ne.s32.totalorder %s174_s12, %s287_s13  ;;  %p293_p4 = scmp.lt.s32.totalorder %s287_s13, %s287_s13 }
  0x2c   :  { %208 = vmatpush3.bf16.msra.mxu0 %v235_v2  ;;  %p294_p5 = por %p293_p4, %p292_p3 }
  0x2d   :  { %209 = vmatprep.subr.bf16.mxu0 %v319_v0 }
  0x2e   :  { %p295_p6 = pnand %p294_p5, %p288_p2 }
  0x30   :  { %210 = vmatpush3.bf16.msra.mxu0 %v236_v3 }
  0x31   :  { %211 = vmatprep.subr.bf16.mxu0 %v319_v0 }
  0x34   :  { %212 = vmatpush3.bf16.msra.mxu0 %v237_v4 }
  0x35   :  { %213 = vmatprep.subr.bf16.mxu0 %v319_v0 }
  0x38   :  { %214 = vmatpush3.bf16.msra.mxu0 %v238_v5 }
  0x39   :  { %215 = vmatprep.subr.bf16.mxu0 %v319_v0 }
  0x3c   :  { %216 = vmatpush3.bf16.msra.mxu0 %v239_v6 }
  0x3d   :  { %217 = vmatprep.subr.bf16.mxu0 %v319_v0 }
  0x40   :  { %218 = vmatpush3.bf16.msra.mxu0 %v240_v7 }
  0x41   :  { %219 = vmatprep.subr.bf16.mxu0 %v319_v0 }
  0x44   :  { %220 = vmatpush3.bf16.msra.mxu0 %v241_v8 }
  0x47   :  { %222 = vmatmul.mubr.bf16.vlgmr.msra.gmra.mrb[0].mxu0 %v242_v9 }
 0x11a   :  { %v157_v11 = vpop.f32.mrb[0].mxu0 }
 0x11b   :  { %v158_v12 = vadd.f32 %v186_v10, %v157_v11  ;;  %v223_v13 = vpop.f32.mrb[1].mxu0 }
 0x11c   :  { %v160_v14 = vpop.f32.mrb[2].mxu0 }
 0x11d   :  { %v164_v15 = vmax.f32 %v158_v12, 0.0  ;;  %v161_v16 = vadd.f32 %v186_v10, %v160_v14  ;;  %v224_v17 = vpop.f32.mrb[3].mxu0 }
 0x11f   :  { %166 = vst [vmem:[#allocation7] sm:$0xff] %v164_v15  ;;  %v165_v18 = vmax.f32 %v161_v16, 0.0 }
 0x121   :  { %167 = vst [vmem:[#allocation7 + $0x8] sm:$0xff] %v165_v18 }
 0x122   :  { %298 = shalt.err (!%p295_p6)
}
 0x123   :  { %s299_s15 = scalar_lea.hbm %s386_s3, 256 }
 0x124   :  { %p300_p7 = scmp.ne.s32.totalorder %s386_s3, %s299_s15  ;;  %p303_p8 = scmp.lt.u32.totalorder %s299_s15, %s386_s3 }
 0x126   :  { %p305_p9 = pnand %p303_p8, %p300_p7 }
 0x128   :  { %308 = shalt.err (!%p305_p9)
}
 0x129   :  { %s322_s20 = smov 128   ;;  %s323_s21 = smov 8  }
 0x12a   :  { %179 = dma.vmem_to_hbm [thread:$0]  %s174_s12, 256, %s386_s3, [#allocation4], %s322_s20, %s322_s20, %s323_s21  }
 0x12b   :  { %313 = dma.done.wait [#allocation4], 256  }
 0x12c   :  { %314 = vsyncadd [#allocation4], 4294967040 }
 0x12d   :  { %183 = vsyncpa [#allocation3], 1 }
 0x12e   :  { %184 = vsyncpa [#allocation6], 1 }
 0x12f   :  { %185 = vsyncpa [#allocation4], 1 }

</bundles_post_ra>
